<compile_context>
chip_gen: v7x
topology: tpu7x:2x2x1
jax: 0.10.0
libtpu: 0.0.40
codegen_flags: <defaults>
</compile_context>

<pallas_src>
import functools

import jax
import jax.numpy as jnp
from jax.experimental import pallas as pl
from jax.experimental.pallas import tpu as pltpu


_MIN_SPLIT = 512                  # don't shrink tiles below ~512 rows just to add steps
_RESIDENT_ACTION_MAX_ROWS = 8192  # lane-padded resident action costs ~512 B/row of VMEM


def _round_up(x: int, m: int) -> int:
    return ((x + m - 1) // m) * m


def _choose_bt(batch: int, block_b: int) -> int:
    """Batch tile: <= block_b, a multiple of 8 (or the full batch for a single
    tile), preferring an even grid-step count >= 2 on large batches so both v7x
    TensorCores get work (a no-op on v5e/v6e)."""
    block_b = max(8, _round_up(block_b, 8))
    if batch <= block_b:
        if batch >= 2 * _MIN_SPLIT:
            return _round_up(pl.cdiv(batch, 2), 8)      # two even steps
        return batch                                    # one full-axis tile
    bt = block_b
    nt = pl.cdiv(batch, bt)
    if nt % 2 == 1:
        bt_even = _round_up(pl.cdiv(batch, nt + 1), 8)
        if bt_even >= _MIN_SPLIT:                       # only if tiles stay large
            bt = bt_even
    return bt


def _mlp_kernel(s_ref, a_ref, w1_ref, b1_ref, w2_ref, b2_ref, w3t_ref, b3_ref,
                o_ref, *, obs_dim, block_b, action_resident):
    """Fused 3-layer MLP for one batch tile.

    Matmul operands are bf16 (native MXU path on all generations), accumulation
    and bias/ReLU are f32.  Output is written lane-dense as a (1, bt) row.
    """
    mm = jnp.bfloat16

    s = s_ref[...].astype(mm)                                   # (bt, obs_dim)
    if action_resident:
        start = pl.multiple_of(pl.program_id(0) * block_b, 8)
        a = a_ref[pl.ds(start, block_b), :].astype(mm)          # slice resident action
    else:
        a = a_ref[...].astype(mm)                               # (bt, act_dim)

    # Layer 1: implicit concat via split matmuls (x_cat @ W1 == s@W1s + a@W1a).
    act_rows = w1_ref.shape[0] - obs_dim
    w1s = w1_ref[pl.ds(0, obs_dim), :]                          # (obs_dim, H1)
    w1a = w1_ref[pl.ds(obs_dim, act_rows), :]                   # (act_dim, H1)
    h = jnp.dot(s, w1s, preferred_element_type=jnp.float32)
    h = h + jnp.dot(a, w1a, preferred_element_type=jnp.float32)
    h = jnp.maximum(h + b1_ref[...], 0.0)                       # (bt, H1) f32

    # Layer 2.
    h = jnp.dot(h.astype(mm), w2_ref[...],
                preferred_element_type=jnp.float32) + b2_ref[...]
    h = jnp.maximum(h, 0.0)                                     # (bt, H2) f32

    # Output layer (out_size=1), lane-dense: (1,H2) x (bt,H2)^T -> (1, bt).
    r = jax.lax.dot_general(w3t_ref[...], h.astype(mm),
                            dimension_numbers=(((1,), (1,)), ((), ())),
                            preferred_element_type=jnp.float32)
    o_ref[...] = r + b3_ref[...]


def basic_reward_net(state, action, params, next_state=None, done=None, *,
                     block_b=1024):
    """Forward pass of BasicRewardNet (default flags).  Returns rewards (B,).

    `next_state` / `done` accepted for API parity but unused
    (use_next_state=False, use_done=False in the default module).
    """
    del next_state, done
    w1, b1, w2, b2, w3, b3 = params

    B = state.shape[0]
    s = state.reshape(B, -1)                    # th.flatten(state, 1) — view, no copy
    a = action.reshape(B, -1)                   # th.flatten(action, 1)
    obs_dim, act_dim = s.shape[1], a.shape[1]
    in_size, H1 = w1.shape
    H2 = w2.shape[1]
    assert in_size == obs_dim + act_dim

    bt = _choose_bt(B, block_b)
    nt = pl.cdiv(B, bt)

    # Small parameters: bf16 matmul operands, f32 biases (negligible bytes).
    w1b = w1.astype(jnp.bfloat16)                               # (in_size, H1)
    w2b = w2.astype(jnp.bfloat16)                               # (H1, H2)
    w3t = w3.reshape(1, H2).astype(jnp.bfloat16)                # (1, H2) for lane-dense out
    b1r = b1.reshape(1, H1).astype(jnp.float32)
    b2r = b2.reshape(1, H2).astype(jnp.float32)
    b3r = b3.reshape(1, 1).astype(jnp.float32)

    # Action rows are tiny; for moderate batches keep the whole action array
    # resident in VMEM instead of a tiny strided DMA per grid step.
    action_resident = (nt > 1) and (nt * bt <= _RESIDENT_ACTION_MAX_ROWS)
    if action_resident:
        if nt * bt != B:
            a = jnp.pad(a, ((0, nt * bt - B), (0, 0)))          # tiny array, cheap
        a_spec = pl.BlockSpec((nt * bt, act_dim), lambda i: (0, 0))
    else:
        a_spec = pl.BlockSpec((bt, act_dim), lambda i: (i, 0))

    kernel = functools.partial(_mlp_kernel, obs_dim=obs_dim, block_b=bt,
                               action_resident=action_resident)

    out = pl.pallas_call(
        kernel,
        out_shape=jax.ShapeDtypeStruct((nt, bt), jnp.float32),
        grid_spec=pltpu.PrefetchScalarGridSpec(
            num_scalar_prefetch=0,
            grid=(nt,),
            in_specs=[
                pl.BlockSpec((bt, obs_dim), lambda i: (i, 0)),   # state tile
                a_spec,                                          # action (tile or resident)
                pl.BlockSpec((in_size, H1), lambda i: (0, 0)),   # W1 (whole, sliced in-kernel)
                pl.BlockSpec((1, H1), lambda i: (0, 0)),         # b1
                pl.BlockSpec((H1, H2), lambda i: (0, 0)),        # W2
                pl.BlockSpec((1, H2), lambda i: (0, 0)),         # b2
                pl.BlockSpec((1, H2), lambda i: (0, 0)),         # W3^T
                pl.BlockSpec((1, 1), lambda i: (0, 0)),          # b3
            ],
            out_specs=pl.BlockSpec((1, bt), lambda i: (i, 0)),   # lane-dense rewards
        ),
        compiler_params=pltpu.CompilerParams(
            dimension_semantics=("parallel",),        # batch tiles shard across v7x TCs
            vmem_limit_bytes=32 * 1024 * 1024,        # safe on v5e/v6e/v7x
        ),
    )(s, a, w1b, b1r, w2b, b2r, w3t, b3r)

    # Rows >= B of the last (partial) tile are garbage and sliced off here.
    return out.reshape(-1)[:B]                                   # squeeze_output -> (B,)


def _reference(state, action, params):
    """Pure-JAX f32 reference for correctness checking."""
    w1, b1, w2, b2, w3, b3 = params
    B = state.shape[0]
    x = jnp.concatenate([state.reshape(B, -1), action.reshape(B, -1)], axis=1)
    h = jax.nn.relu(x @ w1 + b1)
    h = jax.nn.relu(h @ w2 + b2)
    return (h @ w3 + b3)[:, 0]


def _init_params(key, in_size, hid_sizes, out_size=1):
    sizes = (in_size,) + tuple(hid_sizes) + (out_size,)
    keys = jax.random.split(key, 2 * (len(sizes) - 1))
    params = []
    for li in range(len(sizes) - 1):
        fan_in, fan_out = sizes[li], sizes[li + 1]
        w = jax.random.normal(keys[2 * li], (fan_in, fan_out), jnp.float32) / jnp.sqrt(fan_in)
        b = jax.random.normal(keys[2 * li + 1], (fan_out,), jnp.float32) * 0.01
        params += [w, b]
    return tuple(params)


def _check(out, ref):
    assert out.shape == ref.shape, (out.shape, ref.shape)
    # bf16 matmul operands with f32 accumulation vs f32 reference.
    assert jnp.allclose(out, ref, rtol=3e-2, atol=3e-2), (out, ref)


if __name__ == "__main__":
    key = jax.random.PRNGKey(0)
    k_s, k_a, k_p, k_s2, k_a2, k_p2 = jax.random.split(key, 6)

    hid_sizes = (32, 32)

    # --- main case: image-like observation, small batch (single full-axis tile)
    B = 2
    obs_shape = (4, 16, 16)                 # flattened obs dim = 1024
    act_dim = 8
    obs_dim = 4 * 16 * 16
    in_size = obs_dim + act_dim             # use_state + use_action (defaults)

    state = jax.random.normal(k_s, (B,) + obs_shape, jnp.float32)
    action = jax.random.normal(k_a, (B, act_dim), jnp.float32)
    params = _init_params(k_p, in_size, hid_sizes)

    out = jax.block_until_ready(basic_reward_net(state, action, params))
    _check(out, _reference(state, action, params))

    # --- second case: exercises multi-step grid, partial tail tile, resident
    #     action slicing, and lane-dense output across steps (still small).
    B2, obs_dim2, act_dim2 = 144, 64, 8
    state2 = jax.random.normal(k_s2, (B2, obs_dim2), jnp.float32)
    action2 = jax.random.normal(k_a2, (B2, act_dim2), jnp.float32)
    params2 = _init_params(k_p2, obs_dim2 + act_dim2, hid_sizes)

    out2 = jax.block_until_ready(
        basic_reward_net(state2, action2, params2, block_b=64))
    _check(out2, _reference(state2, action2, params2))

    print("KERNEL_OK")
</pallas_src>

<mosaic_0001>
module attributes {stable_mosaic.version = 11 : i64} {
  func.func @_mlp_kernel(%arg0: i32, %arg1: memref<2x1024xf32, #tpu.memory_space<vmem>>, %arg2: memref<2x8xf32, #tpu.memory_space<vmem>>, %arg3: memref<1032x32xbf16, #tpu.memory_space<vmem>>, %arg4: memref<1x32xf32, #tpu.memory_space<vmem>>, %arg5: memref<32x32xbf16, #tpu.memory_space<vmem>>, %arg6: memref<1x32xf32, #tpu.memory_space<vmem>>, %arg7: memref<1x32xbf16, #tpu.memory_space<vmem>>, %arg8: memref<1x1xf32, #tpu.memory_space<vmem>>, %arg9: memref<1x2xf32, #tpu.memory_space<vmem>>) attributes {dimension_semantics = [#tpu.dimension_semantics<parallel>], iteration_bounds = array<i64: 1>, scalar_prefetch = 0 : i64, scratch_operands = 0 : i64, tpu.core_type = #tpu.core_type<tc>, window_params = [{transform_indices = @transform_0, window_bounds = array<i64: 2, 1024>}, {transform_indices = @transform_1, window_bounds = array<i64: 2, 8>}, {pipeline_mode = #tpu.pipeline_mode<synchronous>, transform_indices = @transform_2, window_bounds = array<i64: 1032, 32>}, {pipeline_mode = #tpu.pipeline_mode<synchronous>, transform_indices = @transform_3, window_bounds = array<i64: 1, 32>}, {pipeline_mode = #tpu.pipeline_mode<synchronous>, transform_indices = @transform_4, window_bounds = array<i64: 32, 32>}, {pipeline_mode = #tpu.pipeline_mode<synchronous>, transform_indices = @transform_5, window_bounds = array<i64: 1, 32>}, {pipeline_mode = #tpu.pipeline_mode<synchronous>, transform_indices = @transform_6, window_bounds = array<i64: 1, 32>}, {pipeline_mode = #tpu.pipeline_mode<synchronous>, transform_indices = @transform_7, window_bounds = array<i64: 1, 1>}, {transform_indices = @transform_8, window_bounds = array<i64: 1, 2>}]} {
    %c0 = arith.constant 0 : index
    %c0_0 = arith.constant 0 : index
    %0 = vector.load %arg1[%c0, %c0_0] : memref<2x1024xf32, #tpu.memory_space<vmem>>, vector<2x1024xf32>
    %1 = arith.truncf %0 : vector<2x1024xf32> to vector<2x1024xbf16>
    %c0_1 = arith.constant 0 : index
    %c0_2 = arith.constant 0 : index
    %2 = vector.load %arg2[%c0_1, %c0_2] : memref<2x8xf32, #tpu.memory_space<vmem>>, vector<2x8xf32>
    %3 = arith.truncf %2 : vector<2x8xf32> to vector<2x8xbf16>
    %c0_3 = arith.constant 0 : index
    %c0_4 = arith.constant 0 : index
    %4 = vector.load %arg3[%c0_3, %c0_4] : memref<1032x32xbf16, #tpu.memory_space<vmem>>, vector<1024x32xbf16>
    %c1024 = arith.constant 1024 : index
    %c0_5 = arith.constant 0 : index
    %5 = vector.load %arg3[%c1024, %c0_5] : memref<1032x32xbf16, #tpu.memory_space<vmem>>, vector<8x32xbf16>
    %cst = arith.constant dense<0.000000e+00> : vector<2x32xf32>
    %6 = tpu.matmul %1, %4, %cst {dimension_numbers = #tpu.dot_dimension_numbers<[1], [0], [0], [1], [0, 0, 1, 1], [], []>} : vector<2x1024xbf16>, vector<1024x32xbf16>, vector<2x32xf32> -> vector<2x32xf32>
    %cst_6 = arith.constant dense<0.000000e+00> : vector<2x32xf32>
    %7 = tpu.matmul %3, %5, %cst_6 {dimension_numbers = #tpu.dot_dimension_numbers<[1], [0], [0], [1], [0, 0, 1, 1], [], []>} : vector<2x8xbf16>, vector<8x32xbf16>, vector<2x32xf32> -> vector<2x32xf32>
    %8 = arith.addf %6, %7 : vector<2x32xf32>
    %c0_7 = arith.constant 0 : index
    %c0_8 = arith.constant 0 : index
    %9 = vector.load %arg4[%c0_7, %c0_8] : memref<1x32xf32, #tpu.memory_space<vmem>>, vector<1x32xf32>
    %10 = vector.broadcast %9 : vector<1x32xf32> to vector<2x32xf32>
    %11 = arith.addf %8, %10 : vector<2x32xf32>
    %cst_9 = arith.constant 0.000000e+00 : f32
    %12 = vector.broadcast %cst_9 : f32 to vector<2x32xf32>
    %13 = arith.maximumf %11, %12 : vector<2x32xf32>
    %14 = arith.truncf %13 : vector<2x32xf32> to vector<2x32xbf16>
    %c0_10 = arith.constant 0 : index
    %c0_11 = arith.constant 0 : index
    %15 = vector.load %arg5[%c0_10, %c0_11] : memref<32x32xbf16, #tpu.memory_space<vmem>>, vector<32x32xbf16>
    %cst_12 = arith.constant dense<0.000000e+00> : vector<2x32xf32>
    %16 = tpu.matmul %14, %15, %cst_12 {dimension_numbers = #tpu.dot_dimension_numbers<[1], [0], [0], [1], [0, 0, 1, 1], [], []>} : vector<2x32xbf16>, vector<32x32xbf16>, vector<2x32xf32> -> vector<2x32xf32>
    %c0_13 = arith.constant 0 : index
    %c0_14 = arith.constant 0 : index
    %17 = vector.load %arg6[%c0_13, %c0_14] : memref<1x32xf32, #tpu.memory_space<vmem>>, vector<1x32xf32>
    %18 = vector.broadcast %17 : vector<1x32xf32> to vector<2x32xf32>
    %19 = arith.addf %16, %18 : vector<2x32xf32>
    %cst_15 = arith.constant 0.000000e+00 : f32
    %20 = vector.broadcast %cst_15 : f32 to vector<2x32xf32>
    %21 = arith.maximumf %19, %20 : vector<2x32xf32>
    %c0_16 = arith.constant 0 : index
    %c0_17 = arith.constant 0 : index
    %22 = vector.load %arg7[%c0_16, %c0_17] : memref<1x32xbf16, #tpu.memory_space<vmem>>, vector<1x32xbf16>
    %23 = arith.truncf %21 : vector<2x32xf32> to vector<2x32xbf16>
    %cst_18 = arith.constant dense<0.000000e+00> : vector<1x2xf32>
    %24 = tpu.matmul %22, %23, %cst_18 {dimension_numbers = #tpu.dot_dimension_numbers<[1], [1], [0], [0], [0, 0, 1, 0], [], []>} : vector<1x32xbf16>, vector<2x32xbf16>, vector<1x2xf32> -> vector<1x2xf32>
    %c0_19 = arith.constant 0 : index
    %c0_20 = arith.constant 0 : index
    %25 = vector.load %arg8[%c0_19, %c0_20] : memref<1x1xf32, #tpu.memory_space<vmem>>, vector<1x1xf32>
    %26 = vector.broadcast %25 : vector<1x1xf32> to vector<1x2xf32>
    %27 = arith.addf %24, %26 : vector<1x2xf32>
    %c0_21 = arith.constant 0 : index
    %c0_22 = arith.constant 0 : index
    %28 = vector.load %arg9[%c0_21, %c0_22] : memref<1x2xf32, #tpu.memory_space<vmem>>, vector<1x2xf32>
    tpu.vector_store %arg9[%c0_21, %c0_22], %27 {strides = array<i32>} : memref<1x2xf32, #tpu.memory_space<vmem>>, vector<1x2xf32>,
    return
  }
  func.func @transform_0(%arg0: i32) -> (i32, i32) {
    %c0_i32 = arith.constant 0 : i32
    %c0_i32_0 = arith.constant 0 : i32
    return %arg0, %c0_i32 : i32, i32
  }
  func.func @transform_1(%arg0: i32) -> (i32, i32) {
    %c0_i32 = arith.constant 0 : i32
    %c0_i32_0 = arith.constant 0 : i32
    return %arg0, %c0_i32 : i32, i32
  }
  func.func @transform_2(%arg0: i32) -> (i32, i32) {
    %c0_i32 = arith.constant 0 : i32
    %c0_i32_0 = arith.constant 0 : i32
    %c0_i32_1 = arith.constant 0 : i32
    return %c0_i32, %c0_i32_0 : i32, i32
  }
  func.func @transform_3(%arg0: i32) -> (i32, i32) {
    %c0_i32 = arith.constant 0 : i32
    %c0_i32_0 = arith.constant 0 : i32
    %c0_i32_1 = arith.constant 0 : i32
    return %c0_i32, %c0_i32_0 : i32, i32
  }
  func.func @transform_4(%arg0: i32) -> (i32, i32) {
    %c0_i32 = arith.constant 0 : i32
    %c0_i32_0 = arith.constant 0 : i32
    %c0_i32_1 = arith.constant 0 : i32
    return %c0_i32, %c0_i32_0 : i32, i32
  }
  func.func @transform_5(%arg0: i32) -> (i32, i32) {
    %c0_i32 = arith.constant 0 : i32
    %c0_i32_0 = arith.constant 0 : i32
    %c0_i32_1 = arith.constant 0 : i32
    return %c0_i32, %c0_i32_0 : i32, i32
  }
  func.func @transform_6(%arg0: i32) -> (i32, i32) {
    %c0_i32 = arith.constant 0 : i32
    %c0_i32_0 = arith.constant 0 : i32
    %c0_i32_1 = arith.constant 0 : i32
    return %c0_i32, %c0_i32_0 : i32, i32
  }
  func.func @transform_7(%arg0: i32) -> (i32, i32) {
    %c0_i32 = arith.constant 0 : i32
    %c0_i32_0 = arith.constant 0 : i32
    %c0_i32_1 = arith.constant 0 : i32
    return %c0_i32, %c0_i32_0 : i32, i32
  }
  func.func @transform_8(%arg0: i32) -> (i32, i32) {
    %c0_i32 = arith.constant 0 : i32
    %c0_i32_0 = arith.constant 0 : i32
    return %arg0, %c0_i32 : i32, i32
  }
}

</mosaic_0001>

<bundles_post_ra>
// kernel: tpu_custom_call.1
= control target key start
LH: loop header
LB: loop body
LE: loop exit
PB: predicated region body
PF: predicated region fallthrough
CT: control target
= control target key end

     0   :  { %s1553_s0 = inlined_call_operand.vmem [shape: f32[2,1024], index: 0, kind: input, shape index: {}]   ;;  %s1554_s1 = inlined_call_operand.vmem [shape: f32[2,8], index: 1, kind: input, shape index: {}]   ;;  %s1555_s2 = inlined_call_operand.vmem [shape: bf16[1032,32], index: 2, kind: input, shape index: {}]   ;;  %s1556_s3 = inlined_call_operand.vmem [shape: f32[1,32], index: 3, kind: input, shape index: {}]   ;;  %s1557_s4 = inlined_call_operand.vmem [shape: bf16[32,32], index: 4, kind: input, shape index: {}]   ;;  %s1558_s5 = inlined_call_operand.vmem [shape: f32[1,32], index: 5, kind: input, shape index: {}]   ;;  %s1559_s6 = inlined_call_operand.vmem [shape: bf16[1,32], index: 6, kind: input, shape index: {}]   ;;  %s1560_s7 = inlined_call_operand.<no memory space> [shape: f32[1,1], index: 7, kind: input, shape index: {}]   ;;  %s1561_s8 = inlined_call_operand.hbm [shape: f32[1,2], index: 8, kind: output, shape index: {}]  }
   0x1   :  { %v13_v0 = vstv %s1560_s7 }
   0x2   :  { %14 = vst [vmem:[#allocation2] sm:$0x1] %v13_v0 }
   0x3   :  { %v217_v1 = vld [vmem:[%s1555_s2 + $0x200] sm:$0xf]  ;;  %vm222_vm0 = vcmask 1043456   ;;  %v1246_v2 = vmov 0.0   ;;  %vm1247_vm1 = vmmov 0   ;;  %vm218_vm2 = vcmask 64512  }
   0x4   :  { %1128 = vmatprep.subr.bf16.mxu0 %v1246_v2  ;;  %v224_v3 = vsel %vm222_vm0, %v217_v1, 0  ;;  %v1154_v4 = vld [vmem:[%s1555_s2 + $0x40] sm:$0xff]   ;;  %1130 = vmatprep.mubr.msk.bf16.mxu0 %vm1247_vm1, %v1246_v2  ;;  %v1158_v10 = vld [vmem:[%s1555_s2 + $0x48] sm:$0xff]   ;;  %v1162_v14 = vld [vmem:[%s1555_s2 + $0x50] sm:$0xff]   ;;  %v41_v33 = vlaneseq  ;;  %v1248_v41 = vmov 1983009808  }
   0x5   :  { %v1155_v5 = vld [vmem:[%s1555_s2] sm:$0xff]   ;;  %1129 = vmatpush3.bf16.msra.mxu0 %v224_v3  ;;  %1035 = vmatprep.subr.bf16.mxu1 %v1154_v4  ;;  %v1159_v11 = vld [vmem:[%s1555_s2 + $0x8] sm:$0xff]   ;;  %v1163_v15 = vld [vmem:[%s1555_s2 + $0x10] sm:$0xff]   ;;  %v39_v42 = vunpack.c.l.s4 %v1248_v41 }
   0x6   :  { %v87_v6 = vld [vmem:[%s1554_s1] sm:$0x3]  ;;  %1036 = vmatpush3.bf16.msra.mxu1 %v1155_v5  ;;  %v1160_v12 = vld [vmem:[%s1555_s2 + $0xc8] sm:$0xff]   ;;  %v1164_v16 = vld [vmem:[%s1555_s2 + $0xd0] sm:$0xff]   ;;  %v1401_v38 = vshrl.u32 %v41_v33, 7 }
   0x7   :  { %v88_v7 = vpack.c.bf16 %v87_v6, %v87_v6  ;;  %v1156_v8 = vld [vmem:[%s1555_s2 + $0xc0] sm:$0xff]   ;;  %1037 = vmatprep.subr.bf16.mxu1 %v1158_v10  ;;  %v1161_v13 = vld [vmem:[%s1555_s2 + $0x88] sm:$0xff]   ;;  %v1165_v17 = vld [vmem:[%s1555_s2 + $0x90] sm:$0xff]   ;;  %v40_v45 = vunpack.c.0.s8 %v39_v42 }
   0x8   :  { %v1157_v9 = vld [vmem:[%s1555_s2 + $0x80] sm:$0xff]   ;;  %1057 = vmatprep.subr.bf16.mxu0 %v1156_v8  ;;  %v1166_v18 = vld [vmem:[%s1555_s2 + $0x58] sm:$0xff]   ;;  %v1174_v26 = vld [vmem:[%s1555_s2 + $0x68] sm:$0xff]  }
   0x9   :  { %1131 = vmatmul.mubr.msk.bf16.vlgmr.msra.gmra.mrb[0].mxu0 %vm218_vm2, %v88_v7  ;;  %v1167_v19 = vld [vmem:[%s1555_s2 + $0x18] sm:$0xff]   ;;  %v1170_v22 = vld [vmem:[%s1555_s2 + $0x60] sm:$0xff]   ;;  %v1175_v27 = vld [vmem:[%s1555_s2 + $0x28] sm:$0xff]   ;;  %v1416_v47 = vsub.s32 %v40_v45, %v1401_v38 }
   0xa   :  { %1058 = vmatpush3.bf16.msra.mxu0 %v1157_v9  ;;  %1038 = vmatpush3.bf16.msra.mxu1 %v1159_v11  ;;  %v1168_v20 = vld [vmem:[%s1555_s2 + $0xd8] sm:$0xff]   ;;  %v1171_v23 = vld [vmem:[%s1555_s2 + $0x20] sm:$0xff]   ;;  %v1176_v28 = vld [vmem:[%s1555_s2 + $0xe8] sm:$0xff]  }
   0xb   :  { %1059 = vmatprep.subr.bf16.mxu0 %v1160_v12  ;;  %1039 = vmatprep.subr.bf16.mxu1 %v1162_v14  ;;  %v1169_v21 = vld [vmem:[%s1555_s2 + $0x98] sm:$0xff]   ;;  %v1172_v24 = vld [vmem:[%s1555_s2 + $0xe0] sm:$0xff]   ;;  %v1177_v29 = vld [vmem:[%s1555_s2 + $0xa8] sm:$0xff]  }
   0xc   :  { %v1173_v25 = vld [vmem:[%s1555_s2 + $0xa0] sm:$0xff]   ;;  %v1178_v30 = vld [vmem:[%s1555_s2 + $0x70] sm:$0xff]   ;;  %v1182_v35 = vld [vmem:[%s1555_s2 + $0x78] sm:$0xff]  }
   0xd   :  { %v1179_v31 = vld [vmem:[%s1555_s2 + $0x30] sm:$0xff]   ;;  %v1183_v36 = vld [vmem:[%s1555_s2 + $0x38] sm:$0xff]   ;;  %v33_v39 = vld [vmem:[%s1553_s0] sm:$0xff] }
   0xe   :  { %1060 = vmatpush3.bf16.msra.mxu0 %v1161_v13  ;;  %1040 = vmatpush3.bf16.msra.mxu1 %v1163_v15  ;;  %v1180_v32 = vld [vmem:[%s1555_s2 + $0xf0] sm:$0xff]   ;;  %v1184_v37 = vld [vmem:[%s1555_s2 + $0xf8] sm:$0xff]   ;;  %v1187_v43 = vld [vmem:[%s1555_s2 + $0x140] sm:$0xff]   ;;  %v37_v44 = vcombine.high %v33_v39, %v33_v39  ;;  %v44_v48 = vrot.slane %v33_v39, %v1416_v47 }
   0xf   :  { %1061 = vmatprep.subr.bf16.mxu0 %v1164_v16  ;;  %1041 = vmatprep.subr.bf16.mxu1 %v1166_v18  ;;  %v1181_v34 = vld [vmem:[%s1555_s2 + $0xb0] sm:$0xff]   ;;  %v1186_v40 = vld [vmem:[%s1555_s2 + $0xb8] sm:$0xff]   ;;  %v1189_v46 = vld [vmem:[%s1555_s2 + $0x1c0] sm:$0xff]  }
  0x10   :  { %v51_v49 = vrot.slane %v37_v44, %v1416_v47  ;;  %v52_v50 = vcombine.high %v44_v48, %v44_v48  ;;  %v1188_v52 = vld [vmem:[%s1555_s2 + $0x100] sm:$0xff]   ;;  %v79_v53 = vpack.c.bf16 %v44_v48, %v44_v48  ;;  %v1191_v58 = vld [vmem:[%s1555_s2 + $0x148] sm:$0xff]   ;;  %v1195_v62 = vld [vmem:[%s1555_s2 + $0x150] sm:$0xff]  }
  0x11   :  { %v1190_v55 = vld [vmem:[%s1555_s2 + $0x180] sm:$0xff]   ;;  %v1193_v59 = vld [vmem:[%s1555_s2 + $0x1c8] sm:$0xff]   ;;  %v1197_v63 = vld [vmem:[%s1555_s2 + $0x1d0] sm:$0xff]  }
  0x12   :  { %1062 = vmatpush3.bf16.msra.mxu0 %v1165_v17  ;;  %1042 = vmatpush3.bf16.msra.mxu1 %v1167_v19  ;;  %v53_v51 = vcombine.high %v51_v49, %v51_v49  ;;  %v81_v54 = vpack.c.bf16 %v51_v49, %v51_v49  ;;  %v80_v56 = vpack.c.bf16 %v52_v50, %v52_v50  ;;  %v1192_v60 = vld [vmem:[%s1555_s2 + $0x108] sm:$0xff]   ;;  %v1196_v0 = vld [vmem:[%s1555_s2 + $0x110] sm:$0xff]   ;;  %v1199_v3 = vld [vmem:[%s1555_s2 + $0x158] sm:$0xff]  }
  0x13   :  { %1063 = vmatprep.subr.bf16.mxu0 %v1168_v20  ;;  %1043 = vmatprep.subr.bf16.mxu1 %v1170_v22  ;;  %v1194_v61 = vld [vmem:[%s1555_s2 + $0x188] sm:$0xff]   ;;  %v1198_v1 = vld [vmem:[%s1555_s2 + $0x190] sm:$0xff]   ;;  %v1201_v4 = vld [vmem:[%s1555_s2 + $0x1d8] sm:$0xff]  }
  0x14   :  { %v82_v57 = vpack.c.bf16 %v53_v51, %v53_v51  ;;  %682 = vmatprep.mubr.bf16.mxu1 %v80_v56  ;;  %v1200_v5 = vld [vmem:[%s1555_s2 + $0x118] sm:$0xff]   ;;  %v1203_v7 = vld [vmem:[%s1555_s2 + $0x160] sm:$0xff]   ;;  %v1207_v11 = vld [vmem:[%s1555_s2 + $0x168] sm:$0xff]  }
  0x15   :  { %v1202_v6 = vld [vmem:[%s1555_s2 + $0x198] sm:$0xff]   ;;  %v1205_v8 = vld [vmem:[%s1555_s2 + $0x1e0] sm:$0xff]   ;;  %v1209_v12 = vld [vmem:[%s1555_s2 + $0x1e8] sm:$0xff]  }
  0x16   :  { %1064 = vmatpush3.bf16.msra.mxu0 %v1169_v21  ;;  %1044 = vmatpush3.bf16.msra.mxu1 %v1171_v23  ;;  %v1204_v9 = vld [vmem:[%s1555_s2 + $0x120] sm:$0xff]   ;;  %v1208_v13 = vld [vmem:[%s1555_s2 + $0x128] sm:$0xff]   ;;  %v1211_v15 = vld [vmem:[%s1555_s2 + $0x170] sm:$0xff]  }
  0x17   :  { %1065 = vmatprep.subr.bf16.mxu0 %v1172_v24  ;;  %1045 = vmatprep.subr.bf16.mxu1 %v1174_v26  ;;  %v1206_v10 = vld [vmem:[%s1555_s2 + $0x1a0] sm:$0xff]   ;;  %v1210_v14 = vld [vmem:[%s1555_s2 + $0x1a8] sm:$0xff]   ;;  %v1213_v16 = vld [vmem:[%s1555_s2 + $0x1f0] sm:$0xff]  }
  0x18   :  { %722 = vmatprep.mubr.bf16.mxu0 %v82_v57  ;;  %v34_v17 = vld [vmem:[%s1553_s0 + $0x8] sm:$0xff]  ;;  %v1212_v20 = vld [vmem:[%s1555_s2 + $0x130] sm:$0xff]  }
  0x19   :  { %v61_v18 = vrot.slane %v34_v17, %v1416_v47  ;;  %v54_v19 = vcombine.high %v34_v17, %v34_v17  ;;  %v1214_v21 = vld [vmem:[%s1555_s2 + $0x1b0] sm:$0xff]  }
  0x1a   :  { %1066 = vmatpush3.bf16.msra.mxu0 %v1173_v25  ;;  %1046 = vmatpush3.bf16.msra.mxu1 %v1175_v27 }
  0x1b   :  { %1067 = vmatprep.subr.bf16.mxu0 %v1176_v28  ;;  %1047 = vmatprep.subr.bf16.mxu1 %v1178_v30  ;;  %v69_v22 = vcombine.high %v61_v18, %v61_v18  ;;  %v68_v23 = vrot.slane %v54_v19, %v1416_v47 }
  0x1e   :  { %1068 = vmatpush3.bf16.msra.mxu0 %v1177_v29  ;;  %1048 = vmatpush3.bf16.msra.mxu1 %v1179_v31 }
  0x1f   :  { %1069 = vmatprep.subr.bf16.mxu0 %v1180_v32  ;;  %1049 = vmatprep.subr.bf16.mxu1 %v1182_v35 }
  0x22   :  { %1070 = vmatpush3.bf16.msra.mxu0 %v1181_v34  ;;  %1050 = vmatpush3.bf16.msra.mxu1 %v1183_v36 }
  0x23   :  { %1071 = vmatprep.subr.bf16.mxu0 %v1184_v37  ;;  %1079 = vmatprep.subr.bf16.mxu1 %v1187_v43 }
  0x25   :  { %683 = vmatmul.mubr.bf16.vlgmr.msra.gmra.mrb[0].mxu1 %v79_v53 }
  0x26   :  { %1072 = vmatpush3.bf16.msra.mxu0 %v1186_v40  ;;  %1080 = vmatpush3.bf16.msra.mxu1 %v1188_v52 }
  0x27   :  { %1101 = vmatprep.subr.bf16.mxu0 %v1189_v46  ;;  %1081 = vmatprep.subr.bf16.mxu1 %v1191_v58 }
  0x29   :  { %723 = vmatmul.mubr.bf16.vlgmr.msra.gmra.mrb[4].mxu0 %v81_v54 }
  0x2a   :  { %1102 = vmatpush3.bf16.msra.mxu0 %v1190_v55  ;;  %1082 = vmatpush3.bf16.msra.mxu1 %v1192_v60 }
  0x2b   :  { %1103 = vmatprep.subr.bf16.mxu0 %v1193_v59  ;;  %1083 = vmatprep.subr.bf16.mxu1 %v1195_v62 }
  0x2e   :  { %1104 = vmatpush3.bf16.msra.mxu0 %v1194_v61  ;;  %1084 = vmatpush3.bf16.msra.mxu1 %v1196_v0 }
  0x2f   :  { %1105 = vmatprep.subr.bf16.mxu0 %v1197_v63  ;;  %1085 = vmatprep.subr.bf16.mxu1 %v1199_v3 }
  0x32   :  { %1106 = vmatpush3.bf16.msra.mxu0 %v1198_v1  ;;  %1086 = vmatpush3.bf16.msra.mxu1 %v1200_v5 }
  0x33   :  { %1107 = vmatprep.subr.bf16.mxu0 %v1201_v4  ;;  %1087 = vmatprep.subr.bf16.mxu1 %v1203_v7 }
  0x36   :  { %1108 = vmatpush3.bf16.msra.mxu0 %v1202_v6  ;;  %1088 = vmatpush3.bf16.msra.mxu1 %v1204_v9 }
  0x37   :  { %1109 = vmatprep.subr.bf16.mxu0 %v1205_v8  ;;  %1089 = vmatprep.subr.bf16.mxu1 %v1207_v11 }
  0x3a   :  { %1110 = vmatpush3.bf16.msra.mxu0 %v1206_v10  ;;  %1090 = vmatpush3.bf16.msra.mxu1 %v1208_v13 }
  0x3b   :  { %1111 = vmatprep.subr.bf16.mxu0 %v1209_v12 }
  0x3e   :  { %1112 = vmatpush3.bf16.msra.mxu0 %v1210_v14 }
  0x3f   :  { %15 = vsyncpa [#allocation4], 0  ;;  %1091 = vmatprep.subr.bf16.mxu1 %v1211_v15  ;;  %1113 = vmatprep.subr.bf16.mxu0 %v1213_v16  ;;  %v1215_v24 = vld [vmem:[%s1555_s2 + $0x178] sm:$0xff]   ;;  %v84_v26 = vpack.c.bf16 %v69_v22, %v69_v22  ;;  %v70_v27 = vcombine.high %v68_v23, %v68_v23  ;;  %v83_v31 = vpack.c.bf16 %v61_v18, %v61_v18  ;;  %v1220_v33 = vld [vmem:[%s1557_s4] sm:$0xff]   ;;  %vm843_vm3 = vcmask 261120  }
  0x40   :  { %v1217_v25 = vld [vmem:[%s1555_s2 + $0x1f8] sm:$0xff]   ;;  %1092 = vmatpush3.bf16.msra.mxu1 %v1212_v20  ;;  %v85_v32 = vpack.c.bf16 %v68_v23, %v68_v23  ;;  %v1221_v34 = vld [vmem:[%s1557_s4 + $0x8] sm:$0xff]   ;;  %v1027_v62 = vld [vmem:[%s1556_s3] ss:$0 sm:$0xff]  ;;  %v1249_v5 = vmov 0   ;;  %v898_v16 = vsub.s32 0, %v1401_v38 }
  0x41   :  { %v1216_v28 = vld [vmem:[%s1555_s2 + $0x138] sm:$0xff]   ;;  %v86_v30 = vpack.c.bf16 %v70_v27, %v70_v27  ;;  %1093 = vmatprep.subr.bf16.mxu1 %v1215_v24  ;;  %762 = vmatprep.mubr.bf16.mxu1 %v84_v26  ;;  %v890_v4 = vld [vmem:[#allocation2] sm:$0x1]  ;;  %vm946_vm4 = vcmask 8192  }
  0x42   :  { %1114 = vmatpush3.bf16.msra.mxu0 %v1214_v21  ;;  %v1218_v29 = vld [vmem:[%s1555_s2 + $0x1b8] sm:$0xff]   ;;  %1153 = vset.pattern.permute.xlu0 %v1249_v5  ;;  %v1028_v6 = vld [vmem:[%s1558_s5] ss:$0 sm:$0xff]  ;;  %s1250_s5 = smov [#allocation3]  }
  0x43   :  { %1115 = vmatprep.subr.bf16.mxu0 %v1217_v25  ;;  %802 = vmatprep.mubr.bf16.mxu0 %v86_v30  ;;  %v888_v15 = vld [vmem:[%s1559_s6] sm:$0x1]  ;;  %s954_s27 = sshll.u32 %s1250_s5, 4  ;;  %s955_s27 = int_to_ptr.vmem [resolvable:$true] %s954_s27 }
  0x44   :  { %1094 = vmatpush3.bf16.msra.mxu1 %v1216_v28  ;;  %893 = vperm.xlu0 %1153, %v890_v4   ;;  %s1222_s28 = scalar_lea.vmem %s955_s27, 16  ;;  %s1226_s29 = scalar_lea.vmem %s955_s27, 32 }
  0x45   :  { %1134 = vmatprep.subr.bf16.mxu1 %v1246_v2  ;;  %p1223_p0 = scmp.ne.s32.totalorder %s955_s27, %s1222_s28  ;;  %p1227_p1 = scmp.lt.s32.totalorder %s955_s27, %s955_s27 }
  0x46   :  { %1116 = vmatpush3.bf16.msra.mxu0 %v1218_v29  ;;  %p1228_p2 = scmp.lt.s32.totalorder %s1226_s29, %s1222_s28 }
  0x47   :  { %1142 = vmatprep.subr.bf16.mxu0 %v1246_v2  ;;  %763 = vmatmul.mubr.bf16.vlgmr.msra.gmra.mrb[4].mxu1 %v83_v31 }
  0x48   :  { %1138 = vmatprep.mubr.msk.bf16.mxu1 %vm1247_vm1, %v1246_v2  ;;  %1135 = vmatpush3.bf16.msra.mxu1 %v1220_v33  ;;  %p1229_p3 = por %p1228_p2, %p1227_p1 }
  0x49   :  { %803 = vmatmul.mubr.bf16.vlgmr.msra.gmra.mrb[8].mxu0 %v85_v32  ;;  %1136 = vmatprep.subr.bf16.mxu1 %v1246_v2 }
  0x4a   :  { %1144 = vmatprep.mubr.msk.bf16.mxu0 %vm1247_vm1, %v1246_v2  ;;  %p1230_p4 = pnand %p1229_p3, %p1223_p0 }
  0x4c   :  { %1137 = vmatpush3.bf16.msra.mxu1 %v1221_v34 }
  0xc3   :  { %v894_v17 = vpop.permute.xlu0 %893 }
  0xc4   :  { %v899_v18 = vrot.slane %v894_v17, %v898_v16 }
  0xdc   :  { %v260_v35 = vpop.f32.mrb[0].mxu0 }
  0xdd   :  { %v1132_v36 = vpop.f32.mrb[1].mxu0 }
  0xde   :  { %v263_v37 = vpop.f32.mrb[2].mxu0 }
  0xdf   :  { %v1133_v39 = vpop.f32.mrb[3].mxu0 }
  0xf8   :  { %v1051_v40 = vpop.f32.mrb[0].mxu1 }
  0xf9   :  { %v1052_v42 = vpop.f32.mrb[1].mxu1 }
  0xfa   :  { %v1053_v44 = vadd.f32 %v1052_v42, %v1051_v40  ;;  %v1054_v45 = vpop.f32.mrb[2].mxu1 }
  0xfb   :  { %v1055_v48 = vpop.f32.mrb[3].mxu1 }
  0xfc   :  { %v1073_v41 = vpop.f32.mrb[4].mxu0  ;;  %v685_v2 = vadd.f32 %v1053_v44, %v260_v35 }
  0xfd   :  { %v1074_v43 = vpop.f32.mrb[5].mxu0 }
  0xfe   :  { %v1075_v46 = vadd.f32 %v1074_v43, %v1073_v41  ;;  %v1076_v47 = vpop.f32.mrb[6].mxu0 }
  0xff   :  { %v1077_v49 = vpop.f32.mrb[7].mxu0 }
 0x100   :  { %v725_v50 = vadd.f32 %v1075_v46, %v685_v2 }
 0x11a   :  { %v1095_v51 = vpop.f32.mrb[4].mxu1 }
 0x11b   :  { %v1096_v53 = vpop.f32.mrb[5].mxu1 }
 0x11c   :  { %v1117_v52 = vpop.f32.mrb[8].mxu0  ;;  %v1097_v55 = vadd.f32 %v1096_v53, %v1095_v51  ;;  %v1098_v56 = vpop.f32.mrb[6].mxu1 }
 0x11d   :  { %v1118_v54 = vpop.f32.mrb[9].mxu0  ;;  %v1099_v59 = vpop.f32.mrb[7].mxu1 }
 0x11e   :  { %v1119_v57 = vadd.f32 %v1118_v54, %v1117_v52  ;;  %v1120_v58 = vpop.f32.mrb[10].mxu0  ;;  %v765_v61 = vadd.f32 %v1097_v55, %v725_v50 }
 0x11f   :  { %v1121_v60 = vpop.f32.mrb[11].mxu0 }
 0x120   :  { %v805_v63 = vadd.f32 %v1119_v57, %v765_v61 }
 0x122   :  { %v817_v0 = vadd.f32 %v1027_v62, %v805_v63 }
 0x124   :  { %v818_v1 = vmax.f32 %v817_v0, 0.0 }
 0x126   :  { %v819_v3 = vpack.c.bf16 %v818_v1, %v818_v1 }
 0x128   :  { %1139 = vmatmul.mubr.msk.bf16.vlgmr.msra.gmra.mrb[8].mxu1 %vm843_vm3, %v819_v3 }
 0x1fb   :  { %v881_v7 = vpop.f32.mrb[8].mxu1 }
 0x1fc   :  { %v882_v8 = vadd.f32 %v1028_v6, %v881_v7  ;;  %v1140_v9 = vpop.f32.mrb[9].mxu1 }
 0x1fd   :  { %v884_v10 = vpop.f32.mrb[10].mxu1 }
 0x1fe   :  { %v887_v11 = vmax.f32 %v882_v8, 0.0  ;;  %v1141_v12 = vpop.f32.mrb[11].mxu1 }
 0x200   :  { %v889_v13 = vpack.c.bf16 %v887_v11, %v887_v11 }
 0x202   :  { %v904_v14 = vsel %vm843_vm3, %v889_v13, 0 }
 0x203   :  { %1143 = vmatpush3.bf16.xpose.msra.mxu0 %v904_v14 }
 0x20a   :  { %1145 = vmatmul.mubr.msk.bf16.vlgmr.msra.gmra.mrb[12].mxu0 %vm843_vm3, %v888_v15 }
 0x2dd   :  { %v940_v19 = vpop.f32.mrb[12].mxu0 }
 0x2de   :  { %v941_v20 = vadd.f32 %v940_v19, %v899_v18  ;;  %v1146_v21 = vpop.f32.mrb[13].mxu0 }
 0x2df   :  { %v943_v22 = vpop.f32.mrb[14].mxu0 }
 0x2e0   :  { %v1147_v23 = vpop.f32.mrb[15].mxu0  ;;  %947 = vst.msk [vmem:[#allocation3] sm:$0x1] %vm946_vm4, %v941_v20 }
 0x2e1   :  { %1233 = shalt.err (!%p1230_p4)
}
 0x2e2   :  { %s1234_s9 = scalar_lea.hbm %s1561_s8, 16 }
 0x2e3   :  { %p1235_p5 = scmp.ne.s32.totalorder %s1561_s8, %s1234_s9  ;;  %p1238_p6 = scmp.lt.u32.totalorder %s1234_s9, %s1561_s8 }
 0x2e5   :  { %p1240_p7 = pnand %p1238_p6, %p1235_p5 }
 0x2e7   :  { %1243 = shalt.err (!%p1240_p7)
}
 0x2e8   :  { %957 = dma.vmem_to_hbm [thread:$0]  %s955_s27, 16, %s1561_s8, [#allocation4]  }
 0x2e9   :  { %1244 = dma.done.wait [#allocation4], 16  }
 0x2ea   :  { %1245 = vsyncadd [#allocation4], 4294967280 }
 0x2eb   :  { %961 = vsyncpa [#allocation4], 1 }

</bundles_post_ra>
